<compile_context>
chip_gen: v5e
topology: v5e:2x2
jax: 0.10.0
libtpu: 0.0.40
codegen_flags: <defaults>
</compile_context>

<pallas_src>
import functools

import jax
import jax.numpy as jnp
from jax.experimental import pallas as pl
from jax.experimental.pallas import tpu as pltpu

GAMMA = 2.0
ALPHA = 4.0


def _focal_modulation(one_minus_p, gamma):
    """(1-p)**gamma, specialized to VPU multiplies for small integer gamma."""
    if float(gamma) == int(gamma) and 0 <= int(gamma) <= 8:
        g = int(gamma)
        if g == 0:
            return jnp.ones_like(one_minus_p)
        out = one_minus_p
        for _ in range(g - 1):
            out = out * one_minus_p
        return out
    return one_minus_p ** gamma  # non-integer gamma: fall back to pow (EUP)


def _focal_loss_kernel(logits_ref, target_ref, out_ref, acc_ref, *,
                       n_rows, gamma, alpha):
    i = pl.program_id(0)
    n_tiles = pl.num_programs(0)

    @pl.when(i == 0)
    def _():
        acc_ref[...] = jnp.zeros_like(acc_ref)

    x = logits_ref[...].astype(jnp.float32)        # (TILE_N, C) in f32
    t = target_ref[...]                            # (TILE_N, 1) int32
    tile_n = x.shape[0]

    # numerically stable log-sum-exp over the class axis
    m = jnp.max(x, axis=-1, keepdims=True)                                  # (TILE_N, 1)
    lse = m + jnp.log(jnp.sum(jnp.exp(x - m), axis=-1, keepdims=True))      # (TILE_N, 1)

    # gather the target-class logit via an in-kernel one-hot mask
    cls = jax.lax.broadcasted_iota(jnp.int32, x.shape, 1)                   # (TILE_N, C)
    tgt_logit = jnp.sum(jnp.where(cls == t, x, 0.0), axis=-1, keepdims=True)

    ce = lse - tgt_logit                            # per-sample CE, (TILE_N, 1)
    p = jnp.exp(-ce)
    loss = _focal_modulation(1.0 - p, gamma) * ce * alpha

    # mask padded rows of a partial last tile so they do not bias the mean
    row = jax.lax.broadcasted_iota(jnp.int32, (tile_n, 1), 0) + i * tile_n
    loss = jnp.where(row < n_rows, loss, 0.0)

    acc_ref[...] = acc_ref[...] + jnp.sum(loss, keepdims=True)              # (1, 1)

    @pl.when(i == n_tiles - 1)
    def _():
        out_ref[...] = acc_ref[...] * (1.0 / n_rows)    # reduction='mean' over true N


def _choose_tile_n(n, c, itemsize):
    """Batch-tile rows: ~4 MiB per (double-buffered) logits buffer, multiple of 8."""
    if n <= 8:
        return n
    budget = 4 * 1024 * 1024
    rows = budget // max(1, c * itemsize)
    rows = max(8, min(rows, 1024, n))
    return max(8, (rows // 8) * 8)


def normal_focal_loss_pallas(logits, target, gamma=GAMMA, alpha=ALPHA):
    n, c = logits.shape
    itemsize = jnp.dtype(logits.dtype).itemsize
    tile_n = _choose_tile_n(n, c, itemsize)
    n_tiles = pl.cdiv(n, tile_n)

    t2 = target.reshape(n, 1).astype(jnp.int32)
    kernel = functools.partial(_focal_loss_kernel, n_rows=n, gamma=gamma, alpha=alpha)

    cost = pl.CostEstimate(
        flops=6 * n * c,
        transcendentals=n * c + 2 * n,
        bytes_accessed=n * c * itemsize + n * 4 + 4,
    )

    out = pl.pallas_call(
        kernel,
        out_shape=jax.ShapeDtypeStruct((1, 1), jnp.float32),
        grid_spec=pltpu.PrefetchScalarGridSpec(
            num_scalar_prefetch=0,
            grid=(n_tiles,),
            in_specs=[
                pl.BlockSpec((tile_n, c), lambda i: (i, 0)),   # logits tile, C full extent
                pl.BlockSpec((tile_n, 1), lambda i: (i, 0)),   # targets tile
            ],
            out_specs=pl.BlockSpec((1, 1), lambda i: (0, 0)),  # resident across the grid
            scratch_shapes=[pltpu.VMEM((1, 1), jnp.float32)],  # running-sum accumulator
        ),
        compiler_params=pltpu.CompilerParams(
            dimension_semantics=("arbitrary",),   # reduction axis (accumulator carried)
            vmem_limit_bytes=32 * 1024 * 1024,
        ),
        cost_estimate=cost,
    )(logits, t2)
    return out[0, 0]


def normal_focal_loss_ref(logits, target, gamma=GAMMA, alpha=ALPHA):
    # pure-JAX reference mirroring F.cross_entropy(reduction='none') + focal
    logp = jax.nn.log_softmax(logits.astype(jnp.float32), axis=-1)
    ce = -jnp.take_along_axis(logp, target[:, None].astype(jnp.int32), axis=-1)[:, 0]
    p = jnp.exp(-ce)
    return jnp.mean(((1.0 - p) ** gamma) * ce * alpha)


if __name__ == "__main__":
    key = jax.random.PRNGKey(0)
    k_logits, k_target = jax.random.split(key)

    # N=20 deliberately NOT a multiple of the 16-row tile -> exercises the
    # remainder-row masking path of the accumulator.
    N, C = 20, 32
    logits = jax.random.normal(k_logits, (N, C), dtype=jnp.float32)
    target = jax.random.randint(k_target, (N,), 0, C, dtype=jnp.int32)

    # float32 path
    loss = jax.block_until_ready(normal_focal_loss_pallas(logits, target))
    ref = jax.block_until_ready(normal_focal_loss_ref(logits, target))
    assert jnp.allclose(loss, ref, rtol=1e-4, atol=1e-4), (loss, ref)

    # bf16 path: no wrapper upcast, kernel reads bf16 straight from HBM
    logits_bf16 = logits.astype(jnp.bfloat16)
    loss_bf16 = jax.block_until_ready(normal_focal_loss_pallas(logits_bf16, target))
    ref_bf16 = jax.block_until_ready(normal_focal_loss_ref(logits_bf16, target))
    assert jnp.allclose(loss_bf16, ref_bf16, rtol=5e-3, atol=5e-3), (loss_bf16, ref_bf16)

    print("KERNEL_OK")
</pallas_src>

<mosaic_0001>
module attributes {stable_mosaic.version = 11 : i64} {
  func.func @_focal_loss_kernel(%arg0: i32, %arg1: memref<16x32xf32, #tpu.memory_space<vmem>>, %arg2: memref<16x1xi32, #tpu.memory_space<vmem>>, %arg3: memref<1x1xf32, #tpu.memory_space<vmem>>, %arg4: memref<1x1xf32, #tpu.memory_space<vmem>>) attributes {dimension_semantics = [#tpu.dimension_semantics<arbitrary>], iteration_bounds = array<i64: 2>, scalar_prefetch = 0 : i64, scratch_operands = 1 : i64, tpu.core_type = #tpu.core_type<tc>, window_params = [{transform_indices = @transform_0, window_bounds = array<i64: 16, 32>}, {transform_indices = @transform_1, window_bounds = array<i64: 16, 1>}, {pipeline_mode = #tpu.pipeline_mode<synchronous>, transform_indices = @transform_2, window_bounds = array<i64: 1, 1>}]} {
    %c0_i32 = arith.constant 0 : i32
    %0 = arith.cmpi eq, %arg0, %c0_i32 : i32
    %1 = arith.extui %0 : i1 to i32
    %c0_i32_0 = arith.constant 0 : i32
    %2 = arith.cmpi ne, %1, %c0_i32_0 : i32
    scf.if %2 {
      %cst_17 = arith.constant 0.000000e+00 : f32
      %50 = vector.broadcast %cst_17 : f32 to vector<1x1xf32>
      %c0_18 = arith.constant 0 : index
      %c0_19 = arith.constant 0 : index
      %51 = vector.load %arg4[%c0_18, %c0_19] : memref<1x1xf32, #tpu.memory_space<vmem>>, vector<1x1xf32>
      tpu.vector_store %arg4[%c0_18, %c0_19], %50 {strides = array<i32>} : memref<1x1xf32, #tpu.memory_space<vmem>>, vector<1x1xf32>,
    } else {
    }
    %c0 = arith.constant 0 : index
    %c0_1 = arith.constant 0 : index
    %3 = vector.load %arg1[%c0, %c0_1] : memref<16x32xf32, #tpu.memory_space<vmem>>, vector<16x32xf32>
    %c0_2 = arith.constant 0 : index
    %c0_3 = arith.constant 0 : index
    %4 = vector.load %arg2[%c0_2, %c0_3] : memref<16x1xi32, #tpu.memory_space<vmem>>, vector<16x1xi32>
    %cst = arith.constant dense<0xFF800000> : vector<16xf32>
    %5 = vector.multi_reduction <maximumf>, %3, %cst [1] : vector<16x32xf32> to vector<16xf32>
    %6 = vector.shape_cast %5 : vector<16xf32> to vector<16x1xf32>
    %7 = vector.broadcast %6 : vector<16x1xf32> to vector<16x32xf32>
    %8 = arith.subf %3, %7 : vector<16x32xf32>
    %9 = math.exp %8 : vector<16x32xf32>
    %cst_4 = arith.constant dense<0.000000e+00> : vector<16xf32>
    %10 = vector.multi_reduction <add>, %9, %cst_4 [1] : vector<16x32xf32> to vector<16xf32>
    %11 = vector.shape_cast %10 : vector<16xf32> to vector<16x1xf32>
    %12 = math.log %11 : vector<16x1xf32>
    %13 = arith.addf %6, %12 : vector<16x1xf32>
    %14 = tpu.iota {dimensions = array<i32: 1>} : vector<16x32xi32>
    %15 = vector.broadcast %4 : vector<16x1xi32> to vector<16x32xi32>
    %16 = arith.cmpi eq, %14, %15 : vector<16x32xi32>
    %cst_5 = arith.constant 0.000000e+00 : f32
    %17 = vector.broadcast %cst_5 : f32 to vector<16x32xf32>
    %18 = arith.select %16, %3, %17 : vector<16x32xi1>, vector<16x32xf32>
    %cst_6 = arith.constant dense<0.000000e+00> : vector<16xf32>
    %19 = vector.multi_reduction <add>, %18, %cst_6 [1] : vector<16x32xf32> to vector<16xf32>
    %20 = vector.shape_cast %19 : vector<16xf32> to vector<16x1xf32>
    %21 = arith.subf %13, %20 : vector<16x1xf32>
    %cst_7 = arith.constant 0.000000e+00 : f32
    %22 = vector.broadcast %cst_7 : f32 to vector<16x1xf32>
    %23 = arith.subf %22, %21 : vector<16x1xf32>
    %24 = math.exp %23 : vector<16x1xf32>
    %cst_8 = arith.constant 1.000000e+00 : f32
    %25 = vector.broadcast %cst_8 : f32 to vector<16x1xf32>
    %26 = arith.subf %25, %24 : vector<16x1xf32>
    %27 = arith.mulf %26, %26 : vector<16x1xf32>
    %28 = arith.mulf %27, %21 : vector<16x1xf32>
    %cst_9 = arith.constant 4.000000e+00 : f32
    %29 = vector.broadcast %cst_9 : f32 to vector<16x1xf32>
    %30 = arith.mulf %28, %29 : vector<16x1xf32>
    %31 = tpu.iota {dimensions = array<i32: 0>} : vector<16x1xi32>
    %c16_i32 = arith.constant 16 : i32
    %32 = arith.muli %arg0, %c16_i32 : i32
    %33 = vector.broadcast %32 : i32 to vector<16x1xi32>
    %34 = arith.addi %31, %33 : vector<16x1xi32>
    %c20_i32 = arith.constant 20 : i32
    %35 = vector.broadcast %c20_i32 : i32 to vector<16x1xi32>
    %36 = arith.cmpi slt, %34, %35 : vector<16x1xi32>
    %cst_10 = arith.constant 0.000000e+00 : f32
    %37 = vector.broadcast %cst_10 : f32 to vector<16x1xf32>
    %38 = arith.select %36, %30, %37 : vector<16x1xi1>, vector<16x1xf32>
    %c0_11 = arith.constant 0 : index
    %c0_12 = arith.constant 0 : index
    %39 = vector.load %arg4[%c0_11, %c0_12] : memref<1x1xf32, #tpu.memory_space<vmem>>, vector<1x1xf32>
    %40 = vector.shape_cast %38 : vector<16x1xf32> to vector<1x16x1xf32>
    %cst_13 = arith.constant dense<0.000000e+00> : vector<1xf32>
    %41 = vector.multi_reduction <add>, %40, %cst_13 [1, 2] : vector<1x16x1xf32> to vector<1xf32>
    %42 = vector.shape_cast %41 : vector<1xf32> to vector<1x1x1xf32>
    %43 = vector.extract %42[0, 0, 0] : f32 from vector<1x1x1xf32>
    %44 = vector.broadcast %43 : f32 to vector<1x1xf32>
    %45 = arith.addf %39, %44 : vector<1x1xf32>
    %c0_14 = arith.constant 0 : index
    %c0_15 = arith.constant 0 : index
    %46 = vector.load %arg4[%c0_14, %c0_15] : memref<1x1xf32, #tpu.memory_space<vmem>>, vector<1x1xf32>
    tpu.vector_store %arg4[%c0_14, %c0_15], %45 {strides = array<i32>} : memref<1x1xf32, #tpu.memory_space<vmem>>, vector<1x1xf32>,
    %c1_i32 = arith.constant 1 : i32
    %47 = arith.cmpi eq, %arg0, %c1_i32 : i32
    %48 = arith.extui %47 : i1 to i32
    %c0_i32_16 = arith.constant 0 : i32
    %49 = arith.cmpi ne, %48, %c0_i32_16 : i32
    scf.if %49 {
      %c0_17 = arith.constant 0 : index
      %c0_18 = arith.constant 0 : index
      %50 = vector.load %arg4[%c0_17, %c0_18] : memref<1x1xf32, #tpu.memory_space<vmem>>, vector<1x1xf32>
      %cst_19 = arith.constant 5.000000e-02 : f32
      %51 = vector.broadcast %cst_19 : f32 to vector<1x1xf32>
      %52 = arith.mulf %50, %51 : vector<1x1xf32>
      %c0_20 = arith.constant 0 : index
      %c0_21 = arith.constant 0 : index
      %53 = vector.load %arg3[%c0_20, %c0_21] : memref<1x1xf32, #tpu.memory_space<vmem>>, vector<1x1xf32>
      tpu.vector_store %arg3[%c0_20, %c0_21], %52 {strides = array<i32>} : memref<1x1xf32, #tpu.memory_space<vmem>>, vector<1x1xf32>,
    } else {
    }
    return
  }
  func.func @transform_0(%arg0: i32) -> (i32, i32) {
    %c0_i32 = arith.constant 0 : i32
    %c0_i32_0 = arith.constant 0 : i32
    return %arg0, %c0_i32 : i32, i32
  }
  func.func @transform_1(%arg0: i32) -> (i32, i32) {
    %c0_i32 = arith.constant 0 : i32
    %c0_i32_0 = arith.constant 0 : i32
    return %arg0, %c0_i32 : i32, i32
  }
  func.func @transform_2(%arg0: i32) -> (i32, i32) {
    %c0_i32 = arith.constant 0 : i32
    %c0_i32_0 = arith.constant 0 : i32
    %c0_i32_1 = arith.constant 0 : i32
    return %c0_i32, %c0_i32_0 : i32, i32
  }
}

</mosaic_0001>

<bundles_post_ra>
// kernel: tpu_custom_call.1
= control target key start
LH: loop header
LB: loop body
LE: loop exit
PB: predicated region body
PF: predicated region fallthrough
CT: control target
= control target key end

     0   :  { %7 = vsyncpa [#allocation4], 0  ;;  %s465_s9 = smov 0   ;;  %s498_s0 = inlined_call_operand.vmem [shape: f32[20,32], index: 0, kind: input, shape index: {}]   ;;  %s499_s1 = inlined_call_operand.vmem [shape: s32[20,1], index: 1, kind: input, shape index: {}]   ;;  %s500_s2 = inlined_call_operand.hbm [shape: f32[1,1], index: 2, kind: output, shape index: {}]  }
   0x1 LB: > { %s471_s10 = sadd.s32 4294967295, %s445_s9   ;;  %p362_p0 = scmp.ge.s32.totalorder %s445_s9, 1  ;;  %s445_s9 = sphi %s465_s9, %s13_s9  }
   0x2   : > { %p136_p1 = scmp.lt.s32.totalorder %s445_s9, 3 }
   0x4   : > { %p137_p2 = pnand %p362_p0, %p136_p1 }
   0x5   : > { %s363_s11 = sshll.u32 (!%p137_p2), %s471_s10, 1  ;;  %p367_p4 = scmp.ne.s32.totalorder (!%p137_p2), %s471_s10, 0 }
   0x6   : > { %140 = sbr.rel (%p137_p2) target bundleno = 505 (0x1f9), region = 28  ;;  %p171_p3 = scmp.lt.s32.totalorder (!%p137_p2), %s363_s11, 2 }
   0xb   : > { %s502_s11 = smov (!%p171_p3, %s363_s11), 2  ;;  %197 = sbr.rel (%p367_p4) target bundleno = 18 (0x12), region = 32 }
   0xc   : > { %s364_s12 = sshll.u32 %s502_s11, 3 }
   0xd   : > { %s174_s15 = scalar_lea.vmem %s498_s0, %s364_s12  ;;  %s188_s18 = scalar_lea.vmem %s499_s1, %s364_s12 }
  0x10   : > { %vm198_vm0 = vcmask 0   ;;  %v447_v0 = vmov 0.0  }
  0x11   : > { %199 = vst.msk [vmem:[#allocation2] sm:$0x1] %vm198_vm0, %v447_v0 }
  0x12 PF: > { %v200_v1 = vld [vmem:[%s174_s15] sm:$0xff]  ;;  %vm204_vm1 = vcmask 261120   ;;  %v448_v4 = vmov 0   ;;  %v201_v5 = vld [vmem:[%s174_s15 + $0x8] sm:$0xff]  ;;  %v229_v8 = vlaneseq  ;;  %s368_s19 = sshll.u32 %s471_s10, 4  ;;  %vm275_vm6 = vcmask 7168  }
  0x13   : > { %v202_v2 = vld [vmem:[%s188_s18] sm:$0xff]  ;;  %v205_v3 = vsel %vm204_vm1, %v200_v1, -inf  ;;  %393 = vset.pattern.permute.xlu1 %v448_v4  ;;  %394 = vset.pattern.permute.xlu0 %v448_v4  ;;  %v208_v6 = vsel %vm204_vm1, %v201_v5, -inf  ;;  %v203_v7 = vld [vmem:[%s188_s18 + $0x8] sm:$0xff]  ;;  %v267_v46 = vstv %s368_s19  ;;  %vm290_vm7 = vcmask 0   ;;  %p369_p5 = scmp.ne.s32.totalorder %s471_s10, 1 }
  0x14   : > { %206 = vmax.xlane.f32.xlu0 %v205_v3  ;;  %232 = vperm.xlu1 %393, %v202_v2   ;;  %v230_v9 = vand.u32 127, %v229_v8  ;;  %v264_v45 = vshrl.u32 %v229_v8, 7 }
  0x16   : > { %v265_v47 = vadd.s32 8, %v264_v45  ;;  %v268_v50 = vadd.s32 %v267_v46, %v264_v45 }
  0x18   : > { %v269_v52 = vadd.s32 %v267_v46, %v265_v47  ;;  %vm270_vm4 = vcmp.lt.s32.totalorder %v268_v50, 20 }
  0x1a   : > { %vm271_vm5 = vcmp.lt.s32.totalorder %v269_v52, 20 }
  0x1c   : > { %209 = vmax.xlane.f32.xlu0 %v208_v6  ;;  %235 = vperm.xlu1 %393, %v203_v7  }
  0x86   : > { %v233_v10 = vpop.permute.xlu1 %232 }
  0x87   : > { %v207_v11 = vpop.xlane.xlu0 %206  ;;  %vm237_vm2 = vcmp.eq.s32.totalorder %v230_v9, %v233_v10 }
  0x88   : > { %v211_v12 = vsub.f32 %v200_v1, %v207_v11  ;;  %v239_v13 = vsel %vm237_vm2, %v200_v1, 0.0 }
  0x89   : > { %v241_v14 = vsel %vm204_vm1, %v239_v13, 0.0 }
  0x8a   : > { %v213_v15 = vmul.f32 1.442695, %v211_v12  ;;  %242 = vadd.xlane.f32.xlu0 %v241_v14 }
  0x8c   : > { %395 = vpow2.f32 %v213_v15 }
  0x8e   : > { %v236_v16 = vpop.permute.xlu1 %235 }
  0x8f   : > { %v210_v17 = vpop.xlane.xlu0 %209  ;;  %vm238_vm3 = vcmp.eq.s32.totalorder %v230_v9, %v236_v16 }
  0x90   : > { %v212_v18 = vsub.f32 %v201_v5, %v210_v17  ;;  %v240_v19 = vsel %vm238_vm3, %v201_v5, 0.0  ;;  %v274_v5 = vld [vmem:[#allocation2] sm:$0x1] }
  0x91   : > { %v244_v20 = vsel %vm204_vm1, %v240_v19, 0.0 }
  0x92   : > { %v396_v21 = vpop.eup %395  ;;  %v215_v22 = vmul.f32 1.442695, %v212_v18  ;;  %245 = vadd.xlane.f32.xlu1 %v244_v20 }
  0x93   : > { %v217_v23 = vsel %vm204_vm1, %v396_v21, 0.0 }
  0x94   : > { %397 = vpow2.f32 %v215_v22  ;;  %218 = vadd.xlane.f32.xlu2 %v217_v23 }
  0x9a   : > { %v398_v24 = vpop.eup %397 }
  0x9b   : > { %v220_v25 = vsel %vm204_vm1, %v398_v24, 0.0 }
  0x9c   : > { %221 = vadd.xlane.f32.xlu2 %v220_v25 }
  0xfd   : > { %v243_v30 = vpop.xlane.xlu0 %242 }
 0x105   : > { %v246_v38 = vpop.xlane.xlu1 %245 }
 0x107   : > { %v219_v26 = vpop.xlane.xlu2 %218 }
 0x108   : > { %399 = vlog2.f32 %v219_v26 }
 0x10e   : > { %v400_v27 = vpop.eup %399 }
 0x10f   : > { %v224_v28 = vmul.f32 0.6931472, %v400_v27  ;;  %v222_v29 = vpop.xlane.xlu2 %221 }
 0x110   : > { %401 = vlog2.f32 %v222_v29 }
 0x111   : > { %v227_v31 = vadd.f32 %v224_v28, %v207_v11 }
 0x113   : > { %v247_v32 = vsub.f32 %v227_v31, %v243_v30 }
 0x115   : > { %v249_v33 = vsub.f32 0.0, %v247_v32 }
 0x116   : > { %v402_v34 = vpop.eup %401 }
 0x117   : > { %v226_v35 = vmul.f32 0.6931472, %v402_v34  ;;  %v251_v36 = vmul.f32 1.442695, %v249_v33 }
 0x119   : > { %v228_v37 = vadd.f32 %v226_v35, %v210_v17  ;;  %403 = vpow2.f32 %v251_v36 }
 0x11b   : > { %v248_v39 = vsub.f32 %v228_v37, %v246_v38 }
 0x11d   : > { %v250_v40 = vsub.f32 0.0, %v248_v39 }
 0x11f   : > { %v404_v41 = vpop.eup %403  ;;  %v253_v42 = vmul.f32 1.442695, %v250_v40 }
 0x120   : > { %v255_v43 = vsub.f32 1.0, %v404_v41 }
 0x121   : > { %405 = vpow2.f32 %v253_v42 }
 0x122   : > { %v257_v44 = vmul.f32 %v255_v43, %v255_v43 }
 0x124   : > { %v259_v48 = vmul.f32 %v257_v44, %v247_v32 }
 0x126   : > { %v261_v54 = vmul.f32 4.0, %v259_v48 }
 0x127   : > { %v406_v49 = vpop.eup %405 }
 0x128   : > { %v256_v51 = vsub.f32 1.0, %v406_v49  ;;  %v272_v57 = vsel %vm270_vm4, %v261_v54, 0.0 }
 0x129   : > { %v276_v59 = vsel %vm275_vm6, %v272_v57, 0.0 }
 0x12a   : > { %v258_v53 = vmul.f32 %v256_v51, %v256_v51 }
 0x12c   : > { %v260_v55 = vmul.f32 %v258_v53, %v248_v39 }
 0x12e   : > { %v262_v56 = vmul.f32 4.0, %v260_v55 }
 0x130   : > { %v273_v58 = vsel %vm271_vm5, %v262_v56, 0.0 }
 0x131   : > { %v277_v60 = vsel %vm275_vm6, %v273_v58, 0.0 }
 0x132   : > { %v278_v61 = vadd.f32 %v277_v60, %v276_v59 }
 0x134   : > { %279 = vadd.xlane.f32.xlu2 %v278_v61 }
 0x1a7   : > { %v280_v62 = vpop.xlane.xlu2 %279 }
 0x1a8   : > { %v281_v63 = vrot.slane %v280_v62, 4 }
 0x1aa   : > { %v282_v0 = vadd.f32 %v281_v63, %v280_v62 }
 0x1ac   : > { %v283_v1 = vrot.slane %v282_v0, 2 }
 0x1ae   : > { %v284_v2 = vadd.f32 %v283_v1, %v282_v0 }
 0x1b0   : > { %v285_v3 = vrot.slane %v284_v2, 1 }
 0x1b2   : > { %v286_v4 = vadd.f32 %v285_v3, %v284_v2 }
 0x1b4   : > { %374 = vpush %v286_v4 }
 0x1e5   : > { %s375_s20 = spop %374  ;;  %295 = sbr.rel (%p369_p5) target bundleno = 500 (0x1f4), region = 36 }
 0x1e6   : > { %v288_v6 = vstv %s375_s20 }
 0x1e7   : > { %v289_v7 = vadd.f32 %v288_v6, %v274_v5 }
 0x1e9   : > { %291 = vst.msk [vmem:[#allocation2] sm:$0x1] %vm290_vm7, %v289_v7 }
 0x1f0   : > { %v296_v8 = vld [vmem:[#allocation2] sm:$0x1] }
 0x1f1   : > { %v297_v9 = vmul.f32 0.05, %v296_v8 }
 0x1f3   : > { %298 = vst.msk [vmem:[#allocation3] sm:$0x1] %vm290_vm7, %v297_v9 }
 0x1f4 PF: > { %p380_p6 = scmp.eq.s32.totalorder %s471_s10, 1  ;;  %s449_s21 = smov [#allocation3]  }
 0x1f5   : > { %s305_s22 = sshll.u32 %s449_s21, 4  ;;  %s307_s25 = sshll.u32 %s500_s2, 4  ;;  %s306_s22 = int_to_ptr.vmem [resolvable:$true] %s305_s22  ;;  %s308_s25 = int_to_ptr.hbm [resolvable:$true] %s307_s25 }
 0x1f6   : > { %377 = dma.vmem_to_hbm [thread:$0]  (%p380_p6), %s306_s22, 16, %s308_s25, [#allocation4]  }
 0x1f7   : > { %440 = dma.done.wait (%p380_p6), [#allocation4], 16  }
 0x1f8   : > { %442 = vsyncadd (%p380_p6), [#allocation4], 4294967280 }
 0x1f9 PF: > { %s13_s9 = sadd.s32 1, %s445_s9  }
 0x1fa   : > { %p10_p7 = scmp.ge.s32.totalorder %s13_s9, 4  }
 0x1fc   :  { %12 = sbr.rel (!%p10_p7) target bundleno = 1 (0x1), region = 66 }
 0x201   :  { %321 = vsyncpa [#allocation4], 1 }
 0x202   :  { %323 = vsyncpa [#allocation4 + $0x1], 1 }

</bundles_post_ra>
